<compile_context>
chip_gen: v7x
topology: tpu7x:2x2x1
jax: 0.10.0
libtpu: 0.0.40
codegen_flags: <defaults>
</compile_context>

<pallas_src>
import functools

import jax
import jax.numpy as jnp
from jax import lax
from jax.experimental import pallas as pl
from jax.experimental.pallas import tpu as pltpu


def _round_up(a, b):
    return (a + b - 1) // b * b


def _vmem_limit_bytes():
    """Scoped-VMEM budget: ~3/4 of physical, capped at 96 MiB."""
    try:
        cap = pltpu.get_tpu_info().vmem_capacity_bytes
        return int(min(cap * 3 // 4, 96 << 20))
    except Exception:
        return 48 << 20  # conservative default, fits v5e / v6e / v7x


def _vmem_footprint(tm, tk, d_model, x_bytes, w_bytes, o_bytes):
    """Estimated scoped-VMEM bytes for one grid step: double-buffered block
    DMAs + resident f32 accumulator + f32 matmul/gate temporaries."""
    blk = (tm * d_model * x_bytes          # x tile
           + 2 * tk * d_model * w_bytes    # w1 + w2 tiles
           + d_model * tk * w_bytes        # w3 tile
           + tm * d_model * o_bytes)       # out tile
    interm = 4 * tm * tk * 4 + tm * tk * w_bytes  # x1/x2/gate temporaries
    return 2 * blk + tm * d_model * 4 + interm


def _hidden_tile_candidates(d_hidden, hidden_tile):
    if d_hidden <= hidden_tile:
        return [d_hidden]
    cands = []
    for c in (hidden_tile, 4096, 2048, 1024, 512, 256, 128):
        if c <= hidden_tile and c % 128 == 0 and d_hidden % c == 0 and c not in cands:
            cands.append(c)
    return cands or [d_hidden]


def _select_tiles(rows, d_model, d_hidden, x_bytes, w_bytes, o_bytes,
                  budget, row_tile, hidden_tile):
    """Pick (tm, tk): maximise the row tile first (fewer weight re-streams
    over HBM), then the largest d_hidden chunk that still fits VMEM."""
    rows8 = _round_up(max(rows, 1), 8)
    tm_cands = sorted({min(t, rows8)
                       for t in (row_tile, 1024, 512, 256, 128, 64, 32, 16, 8)
                       if t >= 8}, reverse=True)
    tk_cands = _hidden_tile_candidates(d_hidden, hidden_tile)
    for tm in tm_cands:
        for tk in tk_cands:
            if _vmem_footprint(tm, tk, d_model,
                               x_bytes, w_bytes, o_bytes) <= budget:
                return tm, tk
    return tm_cands[-1], tk_cands[-1]


def _swiglu_kernel(x_ref, w1_ref, w2_ref, w3_ref, o_ref, acc_ref):
    """One (row-tile, d_hidden-chunk) grid step.

    x_ref : (tm, d_model)
    w1_ref: (tk, d_model)  rows [k*tk, (k+1)*tk)       of fc12.weight (x1 half)
    w2_ref: (tk, d_model)  rows [d_hidden + k*tk, ...) of fc12.weight (x2 half)
    w3_ref: (d_model, tk)  cols [k*tk, (k+1)*tk)       of fc3.weight
    o_ref : (tm, d_model)
    acc_ref: (tm, d_model) f32 scratch, resident across the k axis
    """
    k = pl.program_id(1)

    @pl.when(k == 0)
    def _():
        acc_ref[...] = jnp.zeros_like(acc_ref)

    x = x_ref[...]
    dn = (((1,), (1,)), ((), ()))  # contract the shared (last) dim, no batch dims
    x1 = lax.dot_general(x, w1_ref[...], dn, preferred_element_type=jnp.float32)
    x2 = lax.dot_general(x, w2_ref[...], dn, preferred_element_type=jnp.float32)
    h = x1 * (x2 * jax.nn.sigmoid(x2))  # SwiGLU gate in f32
    acc_ref[...] += lax.dot_general(h.astype(w3_ref.dtype), w3_ref[...], dn,
                                    preferred_element_type=jnp.float32)

    @pl.when(k == pl.num_programs(1) - 1)
    def _():
        o_ref[...] = acc_ref[...].astype(o_ref.dtype)


@functools.partial(jax.jit, static_argnames=("row_tile", "hidden_tile"))
def feed_forward(x, w12, w3, *, row_tile=1024, hidden_tile=1024):
    """SwiGLU MLP forward (matches the PyTorch FeedForward module).

    x   : (..., d_model)
    w12 : (2*d_hidden, d_model)   -- fc12.weight, PyTorch (out, in) layout
    w3  : (d_model, d_hidden)     -- fc3.weight,  PyTorch (out, in) layout
    """
    orig_shape = x.shape
    d_model = orig_shape[-1]
    d_hidden = w12.shape[0] // 2
    assert w12.shape == (2 * d_hidden, d_model)
    assert w3.shape == (d_model, d_hidden)

    out_dtype = x.dtype
    compute_dtype = w12.dtype
    x2d = x.reshape(-1, d_model).astype(compute_dtype)
    rows = x2d.shape[0]

    x_bytes = jnp.dtype(compute_dtype).itemsize
    w_bytes = jnp.dtype(w12.dtype).itemsize
    o_bytes = jnp.dtype(out_dtype).itemsize

    # Pick tiles that fit the scoped-VMEM budget of this chip generation.
    vmem_limit = _vmem_limit_bytes()
    budget = int(vmem_limit * 0.85)
    tm, tk = _select_tiles(rows, d_model, d_hidden,
                           x_bytes, w_bytes, o_bytes,
                           budget, row_tile, hidden_tile)

    rows_padded = _round_up(rows, tm)
    if rows_padded != rows:
        x2d = jnp.pad(x2d, ((0, rows_padded - rows), (0, 0)))

    num_k = max(d_hidden // tk, 1)
    grid = (rows_padded // tm, num_k)

    cost = pl.CostEstimate(
        flops=6 * rows * d_model * d_hidden + 4 * rows * d_hidden,
        transcendentals=rows * d_hidden,
        bytes_accessed=(rows * d_model * (x_bytes + o_bytes)
                        + grid[0] * 3 * d_model * d_hidden * w_bytes),
    )

    out = pl.pallas_call(
        _swiglu_kernel,
        out_shape=jax.ShapeDtypeStruct((rows_padded, d_model), out_dtype),
        grid_spec=pltpu.PrefetchScalarGridSpec(
            num_scalar_prefetch=0,
            grid=grid,
            in_specs=[
                pl.BlockSpec((tm, d_model), lambda i, k: (i, 0)),
                pl.BlockSpec((tk, d_model), lambda i, k: (k, 0)),
                pl.BlockSpec((tk, d_model), lambda i, k: (num_k + k, 0)),
                pl.BlockSpec((d_model, tk), lambda i, k: (0, k)),
            ],
            out_specs=pl.BlockSpec((tm, d_model), lambda i, k: (i, 0)),
            scratch_shapes=[pltpu.VMEM((tm, d_model), jnp.float32)],
        ),
        compiler_params=pltpu.CompilerParams(
            dimension_semantics=("parallel", "arbitrary"),
            vmem_limit_bytes=vmem_limit,
        ),
        cost_estimate=cost,
    )(x2d, w12, w12, w3)

    if rows_padded != rows:
        out = out[:rows]
    return out.reshape(orig_shape)


def feed_forward_ref(x, w12, w3):
    """Pure-JAX reference matching the PyTorch module."""
    d_hidden = w12.shape[0] // 2
    h = x @ w12.T
    x1, x2 = h[..., :d_hidden], h[..., d_hidden:]
    h = x1 * (x2 * jax.nn.sigmoid(x2))
    return h @ w3.T


if __name__ == "__main__":
    # Small shapes consistent with the module's forward.
    batch, seq, d_model, d_hidden = 2, 8, 32, 64

    key = jax.random.PRNGKey(0)
    kx, k12, k3 = jax.random.split(key, 3)

    x = jax.random.normal(kx, (batch, seq, d_model), dtype=jnp.float32)
    w12 = jax.random.normal(k12, (2 * d_hidden, d_model), jnp.float32) * (
        1.0 / d_model ** 0.5)
    w3 = jax.random.normal(k3, (d_model, d_hidden), jnp.float32) * (
        1.0 / d_hidden ** 0.5)

    # --- f32 path, tight tolerance ---
    out = jax.block_until_ready(feed_forward(x, w12, w3))
    ref = feed_forward_ref(x, w12, w3)
    assert out.shape == (batch, seq, d_model)
    assert jnp.allclose(out, ref, atol=1e-4, rtol=1e-4), "f32 mismatch vs reference"

    # --- bf16 weights/activations (recommended for real sizes), loose tol ---
    xb = x.astype(jnp.bfloat16)
    w12b = w12.astype(jnp.bfloat16)
    w3b = w3.astype(jnp.bfloat16)
    out_b = jax.block_until_ready(feed_forward(xb, w12b, w3b))
    ref_b = feed_forward_ref(xb.astype(jnp.float32), w12b.astype(jnp.float32),
                             w3b.astype(jnp.float32))
    assert out_b.dtype == jnp.bfloat16
    assert float(jnp.max(jnp.abs(out_b.astype(jnp.float32) - ref_b))) < 5e-2, \
        "bf16 mismatch vs reference"

    # --- medium shape exercising row padding + the d_hidden reduction axis ---
    d_model2, d_hidden2, rows2 = 128, 1024, 100
    k1, k2, k3b = jax.random.split(jax.random.PRNGKey(1), 3)
    x2 = jax.random.normal(k1, (rows2, d_model2), jnp.float32)
    w12_2 = jax.random.normal(k2, (2 * d_hidden2, d_model2), jnp.float32) * (
        1.0 / d_model2 ** 0.5)
    w3_2 = jax.random.normal(k3b, (d_model2, d_hidden2), jnp.float32) * (
        1.0 / d_hidden2 ** 0.5)
    out2 = jax.block_until_ready(feed_forward(x2, w12_2, w3_2))
    ref2 = feed_forward_ref(x2, w12_2, w3_2)
    assert jnp.allclose(out2, ref2, atol=1e-3, rtol=1e-3), "medium mismatch vs reference"

    print("KERNEL_OK")
</pallas_src>

<mosaic_0001>
module attributes {stable_mosaic.version = 11 : i64} {
  func.func @_swiglu_kernel(%arg0: i32, %arg1: i32, %arg2: memref<16x32xf32, #tpu.memory_space<vmem>>, %arg3: memref<64x32xf32, #tpu.memory_space<vmem>>, %arg4: memref<64x32xf32, #tpu.memory_space<vmem>>, %arg5: memref<32x64xf32, #tpu.memory_space<vmem>>, %arg6: memref<16x32xf32, #tpu.memory_space<vmem>>, %arg7: memref<16x32xf32, #tpu.memory_space<vmem>>) attributes {dimension_semantics = [#tpu.dimension_semantics<parallel>, #tpu.dimension_semantics<arbitrary>], iteration_bounds = array<i64: 1, 1>, scalar_prefetch = 0 : i64, scratch_operands = 1 : i64, tpu.core_type = #tpu.core_type<tc>, window_params = [{transform_indices = @transform_0, window_bounds = array<i64: 16, 32>}, {transform_indices = @transform_1, window_bounds = array<i64: 64, 32>}, {transform_indices = @transform_2, window_bounds = array<i64: 64, 32>}, {transform_indices = @transform_3, window_bounds = array<i64: 32, 64>}, {transform_indices = @transform_4, window_bounds = array<i64: 16, 32>}]} {
    %c0_i32 = arith.constant 0 : i32
    %0 = arith.cmpi eq, %arg1, %c0_i32 : i32
    %1 = arith.extui %0 : i1 to i32
    %c0_i32_0 = arith.constant 0 : i32
    %2 = arith.cmpi ne, %1, %c0_i32_0 : i32
    scf.if %2 {
      %cst_17 = arith.constant 0.000000e+00 : f32
      %23 = vector.broadcast %cst_17 : f32 to vector<16x32xf32>
      %c0_18 = arith.constant 0 : index
      %c0_19 = arith.constant 0 : index
      %24 = vector.load %arg7[%c0_18, %c0_19] : memref<16x32xf32, #tpu.memory_space<vmem>>, vector<16x32xf32>
      tpu.vector_store %arg7[%c0_18, %c0_19], %23 {strides = array<i32>} : memref<16x32xf32, #tpu.memory_space<vmem>>, vector<16x32xf32>,
    } else {
    }
    %c0 = arith.constant 0 : index
    %c0_1 = arith.constant 0 : index
    %3 = vector.load %arg2[%c0, %c0_1] : memref<16x32xf32, #tpu.memory_space<vmem>>, vector<16x32xf32>
    %c0_2 = arith.constant 0 : index
    %c0_3 = arith.constant 0 : index
    %4 = vector.load %arg3[%c0_2, %c0_3] : memref<64x32xf32, #tpu.memory_space<vmem>>, vector<64x32xf32>
    %cst = arith.constant dense<0.000000e+00> : vector<16x64xf32>
    %5 = tpu.matmul %3, %4, %cst {dimension_numbers = #tpu.dot_dimension_numbers<[1], [1], [0], [0], [0, 0, 1, 0], [], []>} : vector<16x32xf32>, vector<64x32xf32>, vector<16x64xf32> -> vector<16x64xf32>
    %c0_4 = arith.constant 0 : index
    %c0_5 = arith.constant 0 : index
    %6 = vector.load %arg4[%c0_4, %c0_5] : memref<64x32xf32, #tpu.memory_space<vmem>>, vector<64x32xf32>
    %cst_6 = arith.constant dense<0.000000e+00> : vector<16x64xf32>
    %7 = tpu.matmul %3, %6, %cst_6 {dimension_numbers = #tpu.dot_dimension_numbers<[1], [1], [0], [0], [0, 0, 1, 0], [], []>} : vector<16x32xf32>, vector<64x32xf32>, vector<16x64xf32> -> vector<16x64xf32>
    %8 = arith.negf %7 : vector<16x64xf32>
    %9 = math.exp %8 : vector<16x64xf32>
    %cst_7 = arith.constant 1.000000e+00 : f32
    %10 = vector.broadcast %cst_7 : f32 to vector<16x64xf32>
    %11 = arith.addf %10, %9 : vector<16x64xf32>
    %12 = arith.divf %10, %11 : vector<16x64xf32>
    %13 = arith.mulf %7, %12 : vector<16x64xf32>
    %14 = arith.mulf %5, %13 : vector<16x64xf32>
    %c0_8 = arith.constant 0 : index
    %c0_9 = arith.constant 0 : index
    %15 = vector.load %arg7[%c0_8, %c0_9] : memref<16x32xf32, #tpu.memory_space<vmem>>, vector<16x32xf32>
    %c0_10 = arith.constant 0 : index
    %c0_11 = arith.constant 0 : index
    %16 = vector.load %arg5[%c0_10, %c0_11] : memref<32x64xf32, #tpu.memory_space<vmem>>, vector<32x64xf32>
    %cst_12 = arith.constant dense<0.000000e+00> : vector<16x32xf32>
    %17 = tpu.matmul %14, %16, %cst_12 {dimension_numbers = #tpu.dot_dimension_numbers<[1], [1], [0], [0], [0, 0, 1, 0], [], []>} : vector<16x64xf32>, vector<32x64xf32>, vector<16x32xf32> -> vector<16x32xf32>
    %18 = arith.addf %15, %17 : vector<16x32xf32>
    %c0_13 = arith.constant 0 : index
    %c0_14 = arith.constant 0 : index
    %19 = vector.load %arg7[%c0_13, %c0_14] : memref<16x32xf32, #tpu.memory_space<vmem>>, vector<16x32xf32>
    tpu.vector_store %arg7[%c0_13, %c0_14], %18 {strides = array<i32>} : memref<16x32xf32, #tpu.memory_space<vmem>>, vector<16x32xf32>,
    %c0_i32_15 = arith.constant 0 : i32
    %20 = arith.cmpi eq, %arg1, %c0_i32_15 : i32
    %21 = arith.extui %20 : i1 to i32
    %c0_i32_16 = arith.constant 0 : i32
    %22 = arith.cmpi ne, %21, %c0_i32_16 : i32
    scf.if %22 {
      %c0_17 = arith.constant 0 : index
      %c0_18 = arith.constant 0 : index
      %23 = vector.load %arg7[%c0_17, %c0_18] : memref<16x32xf32, #tpu.memory_space<vmem>>, vector<16x32xf32>
      %c0_19 = arith.constant 0 : index
      %c0_20 = arith.constant 0 : index
      %24 = vector.load %arg6[%c0_19, %c0_20] : memref<16x32xf32, #tpu.memory_space<vmem>>, vector<16x32xf32>
      tpu.vector_store %arg6[%c0_19, %c0_20], %23 {strides = array<i32>} : memref<16x32xf32, #tpu.memory_space<vmem>>, vector<16x32xf32>,
    } else {
    }
    return
  }
  func.func @transform_0(%arg0: i32, %arg1: i32) -> (i32, i32) {
    %c0_i32 = arith.constant 0 : i32
    %c0_i32_0 = arith.constant 0 : i32
    return %arg0, %c0_i32 : i32, i32
  }
  func.func @transform_1(%arg0: i32, %arg1: i32) -> (i32, i32) {
    %c0_i32 = arith.constant 0 : i32
    %c0_i32_0 = arith.constant 0 : i32
    return %arg1, %c0_i32 : i32, i32
  }
  func.func @transform_2(%arg0: i32, %arg1: i32) -> (i32, i32) {
    %c1_i32 = arith.constant 1 : i32
    %0 = arith.addi %c1_i32, %arg1 : i32
    %c0_i32 = arith.constant 0 : i32
    %c0_i32_0 = arith.constant 0 : i32
    return %0, %c0_i32 : i32, i32
  }
  func.func @transform_3(%arg0: i32, %arg1: i32) -> (i32, i32) {
    %c0_i32 = arith.constant 0 : i32
    %c0_i32_0 = arith.constant 0 : i32
    return %c0_i32, %arg1 : i32, i32
  }
  func.func @transform_4(%arg0: i32, %arg1: i32) -> (i32, i32) {
    %c0_i32 = arith.constant 0 : i32
    %c0_i32_0 = arith.constant 0 : i32
    return %arg0, %c0_i32 : i32, i32
  }
}

</mosaic_0001>

<bundles_post_ra>
// kernel: feed_forward.1
= control target key start
LH: loop header
LB: loop body
LE: loop exit
PB: predicated region body
PF: predicated region fallthrough
CT: control target
= control target key end

     0   :  { %vm44_vm0 = vcmask 261120   ;;  %s785_s0 = inlined_call_operand.vmem [shape: f32[16,32], index: 0, kind: input, shape index: {}]   ;;  %s786_s1 = inlined_call_operand.vmem [shape: f32[128,32], index: 1, kind: input, shape index: {}, may-alias: {1,2}]   ;;  %s787_s2 = inlined_call_operand.vmem [shape: f32[128,32], index: 2, kind: input, shape index: {}, may-alias: {1,2}]   ;;  %s788_s3 = inlined_call_operand.vmem [shape: f32[32,64], index: 3, kind: input, shape index: {}]   ;;  %s789_s4 = inlined_call_operand.hbm [shape: f32[16,32], index: 4, kind: output, shape index: {}]  }
   0x1   :  { %v429_v0 = vld [vmem:[%s787_s2 + $0x40] sm:$0xff]  ;;  %v430_v1 = vld [vmem:[%s787_s2 + $0x48] sm:$0xff]  ;;  %v431_v2 = vld [vmem:[%s787_s2 + $0x50] sm:$0xff] }
   0x2   :  { %vm666_vm1 = vmpackc.low %vm44_vm0, %vm44_vm0  ;;  %v554_v4 = vpack.c.bf16 %v430_v1, %v429_v0  ;;  %v432_v5 = vld [vmem:[%s787_s2 + $0x58] sm:$0xff]  ;;  %v49_v7 = vld [vmem:[%s786_s1] sm:$0xff] }
   0x3   :  { %v560_v6 = vpack.c.bf16 %v432_v5, %v431_v2  ;;  %v50_v8 = vld [vmem:[%s786_s1 + $0x8] sm:$0xff]  ;;  %v47_v9 = vld [vmem:[%s785_s0] sm:$0xff]  ;;  %v51_v11 = vld [vmem:[%s786_s1 + $0x10] sm:$0xff] }
   0x4   :  { %556 = vmatprep.subr.msk.bf16.mxu1 %vm666_vm1, %v554_v4  ;;  %v530_v10 = vpack.c.bf16 %v50_v8, %v49_v7  ;;  %516 = vmatprep.mubr.msk.f32.mxu1 %vm44_vm0, %v47_v9  ;;  %v52_v12 = vld [vmem:[%s786_s1 + $0x18] sm:$0xff]  ;;  %v433_v14 = vld [vmem:[%s787_s2 + $0x60] sm:$0xff]  ;;  %v434_v15 = vld [vmem:[%s787_s2 + $0x68] sm:$0xff] }
   0x5   :  { %559 = vmatpush3.bf16.xpose.msk.msra.mxu1 %vm666_vm1, %v554_v4  ;;  %v536_v13 = vpack.c.bf16 %v52_v12, %v51_v11  ;;  %497 = vmatprep.mubr.msk.f32.mxu0 %vm44_vm0, %v47_v9 }
   0x6   :  { %562 = vmatprep.subr.msk.bf16.mxu1 %vm666_vm1, %v560_v6  ;;  %532 = vmatprep.subr.msk.bf16.mxu0 %vm666_vm1, %v530_v10 }
   0x7   :  { %9 = vsyncpa [#allocation4], 0  ;;  %535 = vmatpush3.bf16.xpose.msk.msra.mxu0 %vm666_vm1, %v530_v10  ;;  %v566_v16 = vpack.c.bf16 %v434_v15, %v433_v14  ;;  %v53_v17 = vld [vmem:[%s786_s1 + $0x20] sm:$0xff]  ;;  %v54_v18 = vld [vmem:[%s786_s1 + $0x28] sm:$0xff]  ;;  %vm292_vm2 = vcmask 523264   ;;  %v626_v33 = vmov 0.0  }
   0x8   :  { %538 = vmatprep.subr.msk.bf16.mxu0 %vm666_vm1, %v536_v13  ;;  %v542_v19 = vpack.c.bf16 %v54_v18, %v53_v17  ;;  %v435_v20 = vld [vmem:[%s787_s2 + $0x70] sm:$0xff]  ;;  %v436_v21 = vld [vmem:[%s787_s2 + $0x78] sm:$0xff]  ;;  %v48_v26 = vld [vmem:[%s785_s0 + $0x8] sm:$0xff]  ;;  %46 = vst.msk [vmem:[#allocation2 + $0x8] sm:$0xff] %vm44_vm0, %v626_v33 }
   0x9   :  { %v572_v22 = vpack.c.bf16 %v436_v21, %v435_v20  ;;  %v55_v23 = vld [vmem:[%s786_s1 + $0x30] sm:$0xff]  ;;  %v56_v24 = vld [vmem:[%s786_s1 + $0x38] sm:$0xff]  ;;  %v288_v27 = vld [vmem:[%s788_s3] sm:$0xff]  ;;  %45 = vst.msk [vmem:[#allocation2] sm:$0xff] %vm44_vm0, %v626_v33 }
   0xa   :  { %v548_v25 = vpack.c.bf16 %v56_v24, %v55_v23  ;;  %v289_v28 = vld [vmem:[%s788_s3 + $0x8] sm:$0xff]  ;;  %vm579_vm3 = vmpackc.low %vm292_vm2, %vm292_vm2  ;;  %v290_v30 = vld [vmem:[%s788_s3 + $0x10] sm:$0xff] }
   0xb   :  { %v578_v29 = vpack.c.bf16 %v289_v28, %v288_v27  ;;  %v291_v31 = vld [vmem:[%s788_s3 + $0x18] sm:$0xff]  ;;  %s627_s3 = smov [#allocation3]  }
   0xc   :  { %v584_v32 = vpack.c.bf16 %v291_v31, %v290_v30  ;;  %s402_s30 = sshll.u32 %s627_s3, 4  ;;  %s403_s30 = int_to_ptr.vmem [resolvable:$true] %s402_s30 }
   0xd   :  { %565 = vmatpush3.bf16.xpose.msk.msra.mxu1 %vm666_vm1, %v560_v6  ;;  %s602_s5 = scalar_lea.vmem %s403_s30, 256  ;;  %p607_p1 = scmp.lt.s32.totalorder %s403_s30, %s403_s30 }
   0xe   :  { %568 = vmatprep.subr.msk.bf16.mxu1 %vm666_vm1, %v566_v16  ;;  %p603_p0 = scmp.ne.s32.totalorder %s403_s30, %s602_s5  ;;  %p608_p2 = scmp.lt.s32.totalorder %s602_s5, %s602_s5 }
   0xf   :  { %541 = vmatpush3.bf16.xpose.msk.msra.mxu0 %vm666_vm1, %v536_v13  ;;  %v287_v50 = vld [vmem:[#allocation2 + $0x8] sm:$0xff] }
  0x10   :  { %544 = vmatprep.subr.msk.bf16.mxu0 %vm666_vm1, %v542_v19  ;;  %v286_v51 = vld [vmem:[#allocation2] sm:$0xff]  ;;  %p609_p3 = por %p608_p2, %p607_p1 }
  0x12   :  { %p610_p4 = pnand %p609_p3, %p603_p0 }
  0x15   :  { %571 = vmatpush3.bf16.xpose.msk.msra.mxu1 %vm666_vm1, %v566_v16 }
  0x16   :  { %574 = vmatprep.subr.msk.bf16.mxu1 %vm666_vm1, %v572_v22 }
  0x17   :  { %547 = vmatpush3.bf16.xpose.msk.msra.mxu0 %vm666_vm1, %v542_v19 }
  0x18   :  { %550 = vmatprep.subr.msk.bf16.mxu0 %vm666_vm1, %v548_v25 }
  0x1d   :  { %577 = vmatpush3.bf16.xpose.msk.msra.mxu1 %vm666_vm1, %v572_v22 }
  0x1f   :  { %553 = vmatpush3.bf16.xpose.msk.msra.mxu0 %vm666_vm1, %v548_v25 }
  0x20   :  { %580 = vmatprep.subr.msk.bf16.mxu0 %vm579_vm3, %v578_v29 }
  0x24   :  { %517 = vmatmul.mubr.msk.f32.vlgmr.msra.gmra.mrb[0].mxu1 %vm44_vm0, %v48_v26 }
  0x26   :  { %498 = vmatmul.mubr.msk.f32.vlgmr.msra.gmra.mrb[0].mxu0 %vm44_vm0, %v48_v26 }
  0x27   :  { %583 = vmatpush3.bf16.xpose.msk.msra.mxu0 %vm579_vm3, %v578_v29 }
  0x28   :  { %586 = vmatprep.subr.msk.bf16.mxu0 %vm579_vm3, %v584_v32 }
  0x2f   :  { %589 = vmatpush3.bf16.xpose.msk.msra.mxu0 %vm579_vm3, %v584_v32 }
  0xf7   :  { %v518_v34 = vpop.f32.mrb[0].mxu1 }
  0xf8   :  { %v448_v35 = vmul.f32 -1.442695, %v518_v34  ;;  %v261_v36 = vpop.f32.mrb[1].mxu1 }
  0xf9   :  { %v447_v37 = vmul.f32 -1.442695, %v261_v36  ;;  %v499_v38 = vpop.f32.mrb[0].mxu0 }
  0xfa   :  { %594 = vpow2.f32 %v448_v35  ;;  %v154_v39 = vpop.f32.mrb[1].mxu0 }
  0xfb   :  { %596 = vpow2.f32 %v447_v37 }
 0x104   :  { %v595_v40 = vpop.eup %594 }
 0x105   :  { %v597_v41 = vpop.eup %596  ;;  %v277_v42 = vadd.f32 1.0, %v595_v40 }
 0x106   :  { %v276_v43 = vadd.f32 1.0, %v597_v41 }
 0x107   :  { %598 = vrcp.f32 %v277_v42 }
 0x108   :  { %600 = vrcp.f32 %v276_v43 }
 0x111   :  { %v599_v44 = vpop.eup %598 }
 0x112   :  { %v601_v45 = vpop.eup %600  ;;  %v283_v46 = vmul.f32 %v599_v44, %v518_v34 }
 0x113   :  { %v282_v47 = vmul.f32 %v601_v45, %v261_v36 }
 0x114   :  { %v285_v48 = vmul.f32 %v499_v38, %v283_v46 }
 0x115   :  { %v284_v49 = vmul.f32 %v282_v47, %v154_v39 }
 0x117   :  { %527 = vmatprep.mubr.msk.f32.mxu0 %vm292_vm2, %v284_v49 }
 0x118   :  { %528 = vmatmul.mubr.msk.f32.vlgmr.msra.gmra.mrb[2].mxu0 %vm292_vm2, %v285_v48 }
 0x1eb   :  { %v529_v52 = vpop.f32.mrb[2].mxu0 }
 0x1ec   :  { %v387_v53 = vadd.f32 %v529_v52, %v287_v50  ;;  %v377_v54 = vpop.f32.mrb[3].mxu0 }
 0x1ed   :  { %v386_v55 = vadd.f32 %v377_v54, %v286_v51 }
 0x1ee   :  { %389 = vst.msk [vmem:[#allocation2 + $0x8] sm:$0xff] %vm44_vm0, %v387_v53 }
 0x1ef   :  { %388 = vst.msk [vmem:[#allocation2] sm:$0xff] %vm44_vm0, %v386_v55 }
 0x1f5   :  { %v394_v56 = vld [vmem:[#allocation2 + $0x8] sm:$0xff] }
 0x1f6   :  { %v393_v57 = vld [vmem:[#allocation2] sm:$0xff]  ;;  %396 = vst.msk [vmem:[#allocation3 + $0x8] sm:$0xff] %vm44_vm0, %v394_v56 }
 0x1f7   :  { %395 = vst.msk [vmem:[#allocation3] sm:$0xff] %vm44_vm0, %v393_v57 }
 0x1f8   :  { %613 = shalt.err (!%p610_p4)
}
 0x1f9   :  { %s614_s8 = scalar_lea.hbm %s789_s4, 256 }
 0x1fa   :  { %p615_p5 = scmp.ne.s32.totalorder %s789_s4, %s614_s8  ;;  %p618_p6 = scmp.lt.u32.totalorder %s614_s8, %s789_s4 }
 0x1fc   :  { %p620_p7 = pnand %p618_p6, %p615_p5 }
 0x1fe   :  { %623 = shalt.err (!%p620_p7)
}
 0x1ff   :  { %s628_s13 = smov 128   ;;  %s629_s14 = smov 8  }
 0x200   :  { %408 = dma.vmem_to_hbm [thread:$0]  %s403_s30, 256, %s789_s4, [#allocation4], %s628_s13, %s628_s13, %s629_s14  }
 0x201   :  { %624 = dma.done.wait [#allocation4], 256  }
 0x202   :  { %625 = vsyncadd [#allocation4], 4294967040 }
 0x203   :  { %412 = vsyncpa [#allocation4], 1 }

</bundles_post_ra>
